<compile_context>
chip_gen: v7x
topology: tpu7x:2x2x1
jax: 0.10.0
libtpu: 0.0.40
codegen_flags: <defaults>
</compile_context>

<pallas_src>
import functools

import jax
import jax.numpy as jnp
from jax.experimental import pallas as pl
from jax.experimental.pallas import tpu as pltpu

LANE = 128


def _round_up(x, m):
    return ((x + m - 1) // m) * m


def gcn_layer_kernel(adj_ref, feat_ref, w_ref, b_ref, out_ref, acc_ref, *, apply_relu):
    """One (row-tile i, k-tile k) step of  out = A_hat @ (feat @ W) + b  [+ ReLU]."""
    k = pl.program_id(1)

    @pl.when(k == 0)
    def _init():
        acc_ref[...] = jnp.zeros_like(acc_ref)

    # Small (tk, Fin) x (Fin, Fout) weight matmul; W is VMEM-resident across the grid.
    fw = jnp.dot(feat_ref[...], w_ref[...], preferred_element_type=jnp.float32)
    # Row-tiled aggregation of the streamed adjacency tile, f32 accumulation on the MXU.
    acc_ref[...] += jnp.dot(adj_ref[...], fw.astype(adj_ref.dtype),
                            preferred_element_type=jnp.float32)

    @pl.when(k == pl.num_programs(1) - 1)
    def _finalize():
        y = acc_ref[...] + b_ref[...]
        if apply_relu:
            y = jnp.maximum(y, 0.0)
        out_ref[...] = y.astype(out_ref.dtype)


def gcn_layer(adj, feat, w, b, *, apply_relu, tm, tk, out_dtype):
    """Tiled  A_hat @ (feat @ W) + b  with optional ReLU.  All dims pre-padded."""
    Np = adj.shape[0]
    Fin = feat.shape[1]
    Fout = w.shape[1]
    grid = (Np // tm, Np // tk)

    adj_isz = jnp.dtype(adj.dtype).itemsize
    feat_isz = jnp.dtype(feat.dtype).itemsize
    flops = 2 * Np * Np * Fout + 2 * Np * Fin * Fout * grid[0]
    bytes_accessed = (Np * Np * adj_isz
                      + grid[0] * Np * Fin * feat_isz
                      + Fin * Fout * jnp.dtype(w.dtype).itemsize
                      + Fout * 4
                      + Np * Fout * jnp.dtype(out_dtype).itemsize)

    return pl.pallas_call(
        functools.partial(gcn_layer_kernel, apply_relu=apply_relu),
        out_shape=jax.ShapeDtypeStruct((Np, Fout), out_dtype),
        grid_spec=pltpu.PrefetchScalarGridSpec(
            num_scalar_prefetch=0,
            grid=grid,
            in_specs=[
                pl.BlockSpec((tm, tk), lambda i, k: (i, k)),      # A_hat tile (streamed)
                pl.BlockSpec((tk, Fin), lambda i, k: (k, 0)),     # feature k-tile
                pl.BlockSpec((Fin, Fout), lambda i, k: (0, 0)),   # W (VMEM-resident)
                pl.BlockSpec((1, Fout), lambda i, k: (0, 0)),     # b (VMEM-resident)
            ],
            out_specs=pl.BlockSpec((tm, Fout), lambda i, k: (i, 0)),
            scratch_shapes=[pltpu.VMEM((tm, Fout), jnp.float32)],
        ),
        compiler_params=pltpu.CompilerParams(
            dimension_semantics=("parallel", "arbitrary"),
            vmem_limit_bytes=48 * 1024 * 1024,
        ),
        cost_estimate=pl.CostEstimate(
            flops=int(flops), transcendentals=0, bytes_accessed=int(bytes_accessed)),
    )(adj, feat, w, b)


def _pick_tiles(N, tm, tk):
    """Power-of-two row/k tiles plus the padded node count both divide."""
    assert tm > 0 and tk > 0 and tm & (tm - 1) == 0 and tk & (tk - 1) == 0, \
        "tile sizes must be powers of two"
    Np = _round_up(N, 8)                 # sublane alignment for row tiles
    while tm > Np:
        tm //= 2
    while tk > Np:
        tk //= 2
    Np = _round_up(Np, max(tm, tk))      # powers of two => lcm == max
    if tk < LANE:                        # lane-dim blocks must be 128-multiples
        tk = Np                          # ... or span the full (small) dimension
    return tm, tk, Np


def gae_forward(adj_norm, x, w1, b1, w2, b2, *, tm=512, tk=512,
                compute_dtype=jnp.float32):
    """GAE forward. compute_dtype=bfloat16 streams A_hat/activations at half the
    HBM traffic (f32 accumulation kept); float32 is bit-faithful to the reference."""
    N, F = x.shape
    H = w1.shape[1]
    E = w2.shape[1]
    Hp = _round_up(H, LANE)              # lane-dense hidden width
    Ep = _round_up(E, LANE)              # lane-dense embedding width

    tm, tk, Np = _pick_tiles(N, tm, tk)

    def pad2(a, r, c):
        return jnp.pad(a, ((0, r - a.shape[0]), (0, c - a.shape[1])))

    # Zero-padding is exact: zero adjacency rows/cols and zero weight cols/rows
    # contribute nothing; padding is sliced off at the end.
    adj_p = pad2(adj_norm, Np, Np).astype(compute_dtype)
    x_p = pad2(x, Np, F).astype(compute_dtype)
    w1_p = pad2(w1, F, Hp).astype(compute_dtype)
    w2_p = pad2(w2, Hp, Ep).astype(compute_dtype)
    b1_p = pad2(b1, 1, Hp).astype(jnp.float32)
    b2_p = pad2(b2, 1, Ep).astype(jnp.float32)

    # Layer 1: H = relu(A_hat @ (X @ W1) + b1)
    h = gcn_layer(adj_p, x_p, w1_p, b1_p, apply_relu=True,
                  tm=tm, tk=tk, out_dtype=compute_dtype)
    # Dropout(0.25): identity at inference.
    # TODO(synk): training-mode dropout would need pltpu.prng_seed + prng_random_bits.
    # Layer 2: Z = A_hat @ (H @ W2) + b2
    z = gcn_layer(adj_p, h, w2_p, b2_p, apply_relu=False,
                  tm=tm, tk=tk, out_dtype=jnp.float32)
    return z[:N, :E]


def build_normalized_adjacency(edge_index, edge_weight, num_nodes):
    """Dense D^-1/2 (A + I) D^-1/2 matching PyG GCNConv(add_self_loops=True).

    A[dst, src] accumulates edge weights (messages flow src -> dst)."""
    src, dst = edge_index[0], edge_index[1]
    if edge_weight is None:
        edge_weight = jnp.ones(src.shape[0], dtype=jnp.float32)
    loop = jnp.arange(num_nodes, dtype=src.dtype)
    src = jnp.concatenate([src, loop])
    dst = jnp.concatenate([dst, loop])
    w = jnp.concatenate([edge_weight, jnp.ones(num_nodes, dtype=jnp.float32)])

    adj = jnp.zeros((num_nodes, num_nodes), dtype=jnp.float32).at[dst, src].add(w)
    deg = adj.sum(axis=1)
    dinv = jnp.where(deg > 0, jax.lax.rsqrt(deg), 0.0)
    return dinv[:, None] * adj * dinv[None, :]


def init_gae_params(key, feat_dim, embed_dim=16, hidden_dim=32):
    """Deterministic glorot-uniform weights + zero biases (PyG GCNConv default)."""
    k1, k2 = jax.random.split(key)

    def glorot(k, fan_in, fan_out):
        lim = (6.0 / (fan_in + fan_out)) ** 0.5
        return jax.random.uniform(k, (fan_in, fan_out), jnp.float32, -lim, lim)

    w1 = glorot(k1, feat_dim, hidden_dim)
    b1 = jnp.zeros((1, hidden_dim), jnp.float32)
    w2 = glorot(k2, hidden_dim, embed_dim)
    b2 = jnp.zeros((1, embed_dim), jnp.float32)
    return w1, b1, w2, b2


if __name__ == "__main__":
    key = jax.random.PRNGKey(0)
    k_x, k_ei, k_ew, k_p = jax.random.split(key, 4)

    num_nodes = 256
    feat_dim = 8
    embed_dim = 16
    hidden_dim = 32
    num_edges = 512

    # Node features and a random directed edge list (+ optional edge weights).
    x = jax.random.normal(k_x, (num_nodes, feat_dim), jnp.float32)
    ei = jax.random.randint(k_ei, (2, num_edges), 0, num_nodes, jnp.int32)
    ew = jax.random.uniform(k_ew, (num_edges,), jnp.float32, 0.5, 1.5)

    # Parameters (deterministic, in-script).
    w1, b1, w2, b2 = init_gae_params(k_p, feat_dim, embed_dim, hidden_dim)

    # Glue: sparse graph -> dense normalized adjacency.
    adj_norm = build_normalized_adjacency(ei, ew, num_nodes)

    # f32 path; tm=tk=128 exercises a real (2, 2) grid at this small size.
    z = gae_forward(adj_norm, x, w1, b1, w2, b2, tm=128, tk=128)
    z = jax.block_until_ready(z)

    # Plain-JAX reference of the same math.
    h_ref = jnp.maximum(adj_norm @ (x @ w1) + b1, 0.0)
    z_ref = adj_norm @ (h_ref @ w2) + b2
    assert z.shape == (num_nodes, embed_dim)
    assert jnp.allclose(z, z_ref, atol=1e-4, rtol=1e-4)

    # bf16-streamed adjacency/activations (halves HBM traffic on the N x N term,
    # f32 MXU accumulation); looser tolerance since operands are rounded to bf16.
    z_bf16 = gae_forward(adj_norm, x, w1, b1, w2, b2, tm=128, tk=128,
                         compute_dtype=jnp.bfloat16)
    z_bf16 = jax.block_until_ready(z_bf16)
    assert jnp.allclose(z_bf16, z_ref, atol=1e-1, rtol=1e-1)

    print("KERNEL_OK")
</pallas_src>

<mosaic_0001>
module attributes {stable_mosaic.version = 11 : i64} {
  func.func @gcn_layer_kernel(%arg0: i32, %arg1: i32, %arg2: memref<128x128xf32, #tpu.memory_space<vmem>>, %arg3: memref<128x8xf32, #tpu.memory_space<vmem>>, %arg4: memref<8x128xf32, #tpu.memory_space<vmem>>, %arg5: memref<1x128xf32, #tpu.memory_space<vmem>>, %arg6: memref<128x128xf32, #tpu.memory_space<vmem>>, %arg7: memref<128x128xf32, #tpu.memory_space<vmem>>) attributes {dimension_semantics = [#tpu.dimension_semantics<parallel>, #tpu.dimension_semantics<arbitrary>], iteration_bounds = array<i64: 2, 2>, scalar_prefetch = 0 : i64, scratch_operands = 1 : i64, tpu.core_type = #tpu.core_type<tc>, window_params = [{transform_indices = @transform_0, window_bounds = array<i64: 128, 128>}, {transform_indices = @transform_1, window_bounds = array<i64: 128, 8>}, {pipeline_mode = #tpu.pipeline_mode<synchronous>, transform_indices = @transform_2, window_bounds = array<i64: 8, 128>}, {pipeline_mode = #tpu.pipeline_mode<synchronous>, transform_indices = @transform_3, window_bounds = array<i64: 1, 128>}, {transform_indices = @transform_4, window_bounds = array<i64: 128, 128>}]} {
    %c0_i32 = arith.constant 0 : i32
    %0 = arith.cmpi eq, %arg1, %c0_i32 : i32
    %1 = arith.extui %0 : i1 to i32
    %c0_i32_0 = arith.constant 0 : i32
    %2 = arith.cmpi ne, %1, %c0_i32_0 : i32
    scf.if %2 {
      %cst_12 = arith.constant 0.000000e+00 : f32
      %14 = vector.broadcast %cst_12 : f32 to vector<128x128xf32>
      %c0_13 = arith.constant 0 : index
      %c0_14 = arith.constant 0 : index
      %15 = vector.load %arg7[%c0_13, %c0_14] : memref<128x128xf32, #tpu.memory_space<vmem>>, vector<128x128xf32>
      tpu.vector_store %arg7[%c0_13, %c0_14], %14 {strides = array<i32>} : memref<128x128xf32, #tpu.memory_space<vmem>>, vector<128x128xf32>,
    } else {
    }
    %c0 = arith.constant 0 : index
    %c0_1 = arith.constant 0 : index
    %3 = vector.load %arg3[%c0, %c0_1] : memref<128x8xf32, #tpu.memory_space<vmem>>, vector<128x8xf32>
    %c0_2 = arith.constant 0 : index
    %c0_3 = arith.constant 0 : index
    %4 = vector.load %arg4[%c0_2, %c0_3] : memref<8x128xf32, #tpu.memory_space<vmem>>, vector<8x128xf32>
    %cst = arith.constant dense<0.000000e+00> : vector<128x128xf32>
    %5 = tpu.matmul %3, %4, %cst {dimension_numbers = #tpu.dot_dimension_numbers<[1], [0], [0], [1], [0, 0, 1, 1], [], []>} : vector<128x8xf32>, vector<8x128xf32>, vector<128x128xf32> -> vector<128x128xf32>
    %c0_4 = arith.constant 0 : index
    %c0_5 = arith.constant 0 : index
    %6 = vector.load %arg7[%c0_4, %c0_5] : memref<128x128xf32, #tpu.memory_space<vmem>>, vector<128x128xf32>
    %c0_6 = arith.constant 0 : index
    %c0_7 = arith.constant 0 : index
    %7 = vector.load %arg2[%c0_6, %c0_7] : memref<128x128xf32, #tpu.memory_space<vmem>>, vector<128x128xf32>
    %cst_8 = arith.constant dense<0.000000e+00> : vector<128x128xf32>
    %8 = tpu.matmul %7, %5, %cst_8 {dimension_numbers = #tpu.dot_dimension_numbers<[1], [0], [0], [1], [0, 0, 1, 1], [], []>} : vector<128x128xf32>, vector<128x128xf32>, vector<128x128xf32> -> vector<128x128xf32>
    %9 = arith.addf %6, %8 : vector<128x128xf32>
    %c0_9 = arith.constant 0 : index
    %c0_10 = arith.constant 0 : index
    %10 = vector.load %arg7[%c0_9, %c0_10] : memref<128x128xf32, #tpu.memory_space<vmem>>, vector<128x128xf32>
    tpu.vector_store %arg7[%c0_9, %c0_10], %9 {strides = array<i32>} : memref<128x128xf32, #tpu.memory_space<vmem>>, vector<128x128xf32>,
    %c1_i32 = arith.constant 1 : i32
    %11 = arith.cmpi eq, %arg1, %c1_i32 : i32
    %12 = arith.extui %11 : i1 to i32
    %c0_i32_11 = arith.constant 0 : i32
    %13 = arith.cmpi ne, %12, %c0_i32_11 : i32
    scf.if %13 {
      %c0_12 = arith.constant 0 : index
      %c0_13 = arith.constant 0 : index
      %14 = vector.load %arg7[%c0_12, %c0_13] : memref<128x128xf32, #tpu.memory_space<vmem>>, vector<128x128xf32>
      %c0_14 = arith.constant 0 : index
      %c0_15 = arith.constant 0 : index
      %15 = vector.load %arg5[%c0_14, %c0_15] : memref<1x128xf32, #tpu.memory_space<vmem>>, vector<1x128xf32>
      %16 = vector.broadcast %15 : vector<1x128xf32> to vector<128x128xf32>
      %17 = arith.addf %14, %16 : vector<128x128xf32>
      %cst_16 = arith.constant 0.000000e+00 : f32
      %18 = vector.broadcast %cst_16 : f32 to vector<128x128xf32>
      %19 = arith.maximumf %17, %18 : vector<128x128xf32>
      %c0_17 = arith.constant 0 : index
      %c0_18 = arith.constant 0 : index
      %20 = vector.load %arg6[%c0_17, %c0_18] : memref<128x128xf32, #tpu.memory_space<vmem>>, vector<128x128xf32>
      tpu.vector_store %arg6[%c0_17, %c0_18], %19 {strides = array<i32>} : memref<128x128xf32, #tpu.memory_space<vmem>>, vector<128x128xf32>,
    } else {
    }
    return
  }
  func.func @transform_0(%arg0: i32, %arg1: i32) -> (i32, i32) {
    %c0_i32 = arith.constant 0 : i32
    return %arg0, %arg1 : i32, i32
  }
  func.func @transform_1(%arg0: i32, %arg1: i32) -> (i32, i32) {
    %c0_i32 = arith.constant 0 : i32
    %c0_i32_0 = arith.constant 0 : i32
    return %arg1, %c0_i32 : i32, i32
  }
  func.func @transform_2(%arg0: i32, %arg1: i32) -> (i32, i32) {
    %c0_i32 = arith.constant 0 : i32
    %c0_i32_0 = arith.constant 0 : i32
    %c0_i32_1 = arith.constant 0 : i32
    return %c0_i32, %c0_i32_0 : i32, i32
  }
  func.func @transform_3(%arg0: i32, %arg1: i32) -> (i32, i32) {
    %c0_i32 = arith.constant 0 : i32
    %c0_i32_0 = arith.constant 0 : i32
    %c0_i32_1 = arith.constant 0 : i32
    return %c0_i32, %c0_i32_0 : i32, i32
  }
  func.func @transform_4(%arg0: i32, %arg1: i32) -> (i32, i32) {
    %c0_i32 = arith.constant 0 : i32
    %c0_i32_0 = arith.constant 0 : i32
    return %arg0, %c0_i32 : i32, i32
  }
}

</mosaic_0001>

<bundles_post_ra>
// kernel: tpu_custom_call.1
= control target key start
LH: loop header
LB: loop body
LE: loop exit
PB: predicated region body
PF: predicated region fallthrough
CT: control target
= control target key end

     0   :  { %9 = vsyncpa [#allocation4], 0  ;;  %s1703_s0 = inlined_call_operand.hbm [shape: f32[256,256], index: 0, kind: input, shape index: {}]   ;;  %s1704_s1 = inlined_call_operand.vmem [shape: f32[256,8], index: 1, kind: input, shape index: {}]   ;;  %s1705_s2 = inlined_call_operand.vmem [shape: f32[8,128], index: 2, kind: input, shape index: {}]   ;;  %s1706_s3 = inlined_call_operand.vmem [shape: f32[1,128], index: 3, kind: input, shape index: {}]   ;;  %s1707_s4 = inlined_call_operand.hbm [shape: f32[256,128], index: 4, kind: output, shape index: {}]  }
   0x1   :  { %11 = vsyncpa [#allocation4 + $0x1], 0 }
   0x2   :  { %12 = vsyncpa [#allocation5], 0 }
   0x3   :  { %14 = vsyncpa [#allocation5 + $0x1], 0  ;;  %s1396_s15 = smov 0   ;;  %s1398_s16 = smov 0  }
   0x4   :  { %s1400_s17 = smov 0   ;;  %s1402_s18 = smov 0  }
   0x5   :  { %s1404_s19 = smov 0   ;;  %s1406_s20 = smov 0  }
   0x6   :  { %s1408_s21 = smov 0   ;;  %s1410_s22 = smov 0  }
   0x7   :  { %s1412_s23 = smov 0   ;;  %s1414_s24 = smov 0  }
   0x8   :  { %s1416_s25 = smov 0  }
   0x9 LB: > { %s883_s26 = sadd.s32 4294967295, %s1361_s25   ;;  %s884_s27 = sadd.s32 4294967294, %s1361_s25   ;;  %s1361_s25 = sphi %s1416_s25, %s20_s25   ;;  %s1357_s24 = sphi %s1414_s24, %s1733_s24   ;;  %s1353_s23 = sphi %s1412_s23, %s1732_s23   ;;  %s1349_s22 = sphi %s1410_s22, %s1731_s22   ;;  %s1345_s21 = sphi %s1408_s21, %s1730_s21   ;;  %s1341_s20 = sphi %s1406_s20, %s1729_s20   ;;  %s1337_s19 = sphi %s1404_s19, %s1728_s19   ;;  %s1333_s18 = sphi %s1402_s18, %s1727_s18   ;;  %s1329_s17 = sphi %s1400_s17, %s1726_s17   ;;  %s1325_s16 = sphi %s1398_s16, %s1725_s16   ;;  %s1321_s15 = sphi %s1396_s15, %s1724_s15  }
   0xa   : > { %s29_s28 = sadd.s32 1, %s1353_s23  ;;  %s32_s29 = sadd.s32 1, %s1357_s24 }
   0xb   : > { %p30_p0 = scmp.ge.s32.totalorder %s29_s28, 2  ;;  %s41_s30 = sadd.s32 1, %s1341_s20 }
   0xc   : > { %p48_p1 = scmp.ne.s32.totalorder %s1341_s20, %s1337_s19  ;;  %p49_p2 = scmp.eq.s32.totalorder %s1361_s25, 0 }
   0xd   : > { %s1735_s28 = smov (%p30_p0, %s29_s28), 0  ;;  %s1737_s29 = smov (!%p30_p0, %s32_s29), %s1357_s24 }
   0xe   : > { %1711 = sst [smem:[#allocation9_spill]] %s1735_s28  ;;  %s37_s5 = ssub.s32 %s1353_s23, %s1735_s28 }
   0xf   : > { %p1462_p3 = por %p49_p2, %p48_p1  ;;  %p34_p4 = scmp.ge.s32.totalorder %s1737_s29, 2 }
  0x10   : > { %p54_p5 = scmp.ne.s32.totalorder %s1337_s19, %s1333_s18  ;;  %p55_p6 = scmp.eq.s32.totalorder %s883_s26, 0 }
  0x11   : > { %s135_s7 = sadd.s32 1, %s1329_s17  ;;  %s1739_s29 = smov (%p34_p4, %s1737_s29), 0 }
  0x12   : > { %1713 = sst [smem:[#allocation10_spill]] %s1739_s29  ;;  %p1470_p7 = por %p55_p6, %p54_p5 }
  0x13   : > { %p145_p8 = scmp.ne.s32.totalorder %s1329_s17, %s1325_s16  ;;  %s36_s9 = ssub.s32 %s1357_s24, %s1739_s29 }
  0x14   : > { %p146_p9 = scmp.eq.s32.totalorder %s883_s26, 3  ;;  %s38_s10 = sor.u32 %s37_s5, %s36_s9 }
  0x15   : > { %p133_p10 = scmp.eq.s32.totalorder %s36_s9, 0  ;;  %p39_p11 = scmp.eq.s32.totalorder %s38_s10, 0 }
  0x16   : > { %p1478_p12 = por %p146_p9, %p145_p8  ;;  %p151_p13 = scmp.ne.s32.totalorder %s1325_s16, %s1321_s15 }
  0x17   : > { %s1483_s12 = scalar_select %p133_p10, %s1329_s17, %s135_s7  }
  0x18   : > { %s1715_s11 = scalar_select %p1478_p12, 1, 0 }
  0x19   : > { %1716 = sst [smem:[#allocation11_spill]] %s1483_s12  ;;  %p152_p0 = scmp.eq.s32.totalorder %s884_s27, 3 }
  0x1a   : > { %s1486_s13 = scalar_select %p39_p11, %s1341_s20, %s41_s30  }
  0x1b   : > { %p1113_p1 = scmp.lt.s32.totalorder %s1361_s25, 4  ;;  %p1491_p2 = por %p152_p0, %p151_p13 }
  0x1c   : > { %s178_s18 = sand.u32 1, %s1341_s20   ;;  %s920_s5 = sshll.u32 %s1357_s24, 5 }
  0x1d   : > { %s1717_s14 = scalar_select %p1491_p2, 1, 0 }
  0x1e   : > { %s887_s26 = sshll.u32 %s178_s18, 7  ;;  %s188_s9 = sadd.s32 %s1353_s23, %s920_s5 }
  0x1f   : > { %s182_s10 = scalar_lea.vmem [#allocation3], %s887_s26  ;;  %s890_s28 = sshll.u32 %s188_s9, 7 }
  0x20   : > { %s191_s29 = sshll.u32 %s182_s10, 4  ;;  %s1503_s30 = scalar_lea.hbm %s1703_s0, %s890_s28  ;;  %s1498_s29 = int_to_ptr.vmem [resolvable:$true] %s191_s29 }
  0x21   : > { %p1507_p4 = pnand %p1113_p1, %p1462_p3  ;;  %s1511_s26 = scalar_lea.sflag [#allocation4], %s178_s18 }
  0x22   : > { %s1209_s5 = scalar_lea.hbm %s1503_s30, 2048  ;;  %s1214_s12 = scalar_lea.hbm %s1703_s0, 8192 }
  0x23   : > { %p1210_p5 = scmp.ne.s32.totalorder %s1503_s30, %s1209_s5  ;;  %p1211_p6 = pneg %p1507_p4 }
  0x24   : > { %p1215_p3 = scmp.lt.u32.totalorder %s1503_s30, %s1703_s0  ;;  %p1216_p10 = scmp.lt.u32.totalorder %s1214_s12, %s1209_s5 }
  0x25   : > { %p1212_p8 = pnand %p1211_p6, %p1210_p5  ;;  %p1218_p13 = scmp.lt.u32.totalorder %s1209_s5, %s1503_s30 }
  0x26   : > { %p1217_p11 = por %p1216_p10, %p1215_p3 }
  0x27   : > { %p1213_p9 = pneg %p1212_p8 }
  0x28   : > { %p1219_p0 = por %p1218_p13, %p1217_p11 }
  0x2a   : > { %p1220_p1 = pnand %p1219_p0, %p1213_p9 }
  0x2c   : > { %1223 = shalt.err (!%p1220_p1)
}
  0x2d   : > { %s1224_s18 = scalar_lea.vmem %s1498_s29, 2048  ;;  %s1363_s7 = smov [#allocation3]  }
  0x2e   : > { %p1225_p5 = scmp.ne.s32.totalorder %s1498_s29, %s1224_s18  ;;  %s1229_s28 = sshll.u32 %s1363_s7, 4  ;;  %s1230_s28 = int_to_ptr.vmem [resolvable:$false] %s1229_s28 }
  0x2f   : > { %s1231_s6 = scalar_lea.vmem %s1230_s28, 4096  ;;  %p1232_p12 = scmp.lt.s32.totalorder %s1498_s29, %s1230_s28 }
  0x30   : > { %p1227_p8 = pnand %p1225_p5, %p1211_p6  ;;  %p1233_p3 = scmp.lt.s32.totalorder %s1231_s6, %s1224_s18 }
  0x32   : > { %p1228_p2 = pneg %p1227_p8  ;;  %p1234_p10 = por %p1233_p3, %p1232_p12 }
  0x34   : > { %p1235_p11 = pnand %p1234_p10, %p1228_p2 }
  0x36   : > { %1238 = shalt.err (!%p1235_p11)
}
  0x37   : > { %s1364_s5 = smov 256   ;;  %s1365_s12 = smov 128  }
  0x38   : > { %s1366_s9 = smov 8   ;;  %p891_p6 = scmp.ge.s32.totalorder %s1361_s25, 1 }
  0x39   : > { %1108 = dma.hbm_to_vmem [thread:$0]  (!%p1507_p4), %s1503_s30, 2048, %s1498_s29, %s1511_s26, %s1364_s5, %s1365_s12, %s1366_s9  }
  0x3a   : > { %p208_p9 = scmp.lt.s32.totalorder %s1361_s25, 5 }
  0x3c   : > { %p209_p13 = pnand %p891_p6, %p208_p9 }
  0x3d   : > { %s214_s10 = sand.u32 (!%p209_p13), 1, %s1337_s19  }
  0x3e   : > { %212 = sbr.rel (%p209_p13) target bundleno = 602 (0x25a), region = 36  ;;  %s892_s18 = sshll.u32 (!%p209_p13), %s214_s10, 7 }
  0x3f   : > { %s215_s7 = scalar_lea.sflag (!%p209_p13), [#allocation4], %s214_s10  ;;  %s1542_s28 = scalar_lea.vmem (!%p209_p13), [#allocation3], %s892_s18 }
  0x45   : > { %1312 = dma.done.wait (%p1470_p7), %s215_s7, 2048  }
  0x46   : > { %1314 = vsyncadd (%p1470_p7), %s215_s7, 4294965248  ;;  %s245_s29 = sand.u32 1, %s1325_s16   ;;  %s894_s30 = sshll.u32 %s1345_s21, 4 }
  0x47   : > { %s893_s27 = sshll.u32 %s245_s29, 7  ;;  %p250_p12 = scmp.lt.s32.totalorder %s894_s30, 31 }
  0x48   : > { %s1557_s9 = scalar_lea.vmem [#allocation6], %s893_s27  ;;  %p896_p2 = scmp.ne.s32.totalorder %s1345_s21, 0 }
  0x49   : > { %s1741_s30 = smov (!%p250_p12, %s894_s30), 31  ;;  %v1367_v0 = vmov (!%p896_p2), 0.0  }
  0x4a   : > { %s895_s26 = sshll.u32 %s1741_s30, 3  ;;  %259 = sbr.rel (%p896_p2) target bundleno = 82 (0x52), region = 44  ;;  %260 = vst [vmem:[#allocation2] sm:$0xff] (!%p896_p2), %v1367_v0  ;;  %261 = vst [vmem:[#allocation2 + $0x8] sm:$0xff] (!%p896_p2), %v1367_v0 }
  0x4b   : > { %s1555_s12 = scalar_lea.vmem %s1704_s1, %s895_s26  ;;  %262 = vst [vmem:[#allocation2 + $0x10] sm:$0xff] (!%p896_p2), %v1367_v0  ;;  %263 = vst [vmem:[#allocation2 + $0x18] sm:$0xff] (!%p896_p2), %v1367_v0 }
  0x4c   : > { %264 = vst [vmem:[#allocation2 + $0x20] sm:$0xff] (!%p896_p2), %v1367_v0  ;;  %265 = vst [vmem:[#allocation2 + $0x28] sm:$0xff] (!%p896_p2), %v1367_v0 }
  0x4d   : > { %266 = vst [vmem:[#allocation2 + $0x30] sm:$0xff] (!%p896_p2), %v1367_v0  ;;  %267 = vst [vmem:[#allocation2 + $0x38] sm:$0xff] (!%p896_p2), %v1367_v0 }
  0x4e   : > { %268 = vst [vmem:[#allocation2 + $0x40] sm:$0xff] (!%p896_p2), %v1367_v0  ;;  %269 = vst [vmem:[#allocation2 + $0x48] sm:$0xff] (!%p896_p2), %v1367_v0 }
  0x4f   : > { %270 = vst [vmem:[#allocation2 + $0x50] sm:$0xff] (!%p896_p2), %v1367_v0  ;;  %271 = vst [vmem:[#allocation2 + $0x58] sm:$0xff] (!%p896_p2), %v1367_v0 }
  0x50   : > { %272 = vst [vmem:[#allocation2 + $0x60] sm:$0xff] (!%p896_p2), %v1367_v0  ;;  %273 = vst [vmem:[#allocation2 + $0x68] sm:$0xff] (!%p896_p2), %v1367_v0 }
  0x51   : > { %274 = vst [vmem:[#allocation2 + $0x70] sm:$0xff] %v1367_v0  ;;  %275 = vst [vmem:[#allocation2 + $0x78] sm:$0xff] %v1367_v0 }
  0x52 PF: > { %v292_v1 = vld [vmem:[%s1705_s2] sm:$0xff]  ;;  %vm293_vm0 = vcmask 64512   ;;  %v277_v3 = vld [vmem:[%s1555_s12 + $0x8] sm:$0xff]  ;;  %v278_v4 = vld [vmem:[%s1555_s12 + $0x10] sm:$0xff]  ;;  %p913_p7 = scmp.ne.s32.totalorder %s1345_s21, 1 }
  0x53   : > { %v276_v2 = vld [vmem:[%s1555_s12] sm:$0xff]  ;;  %971 = vmatprep.subr.mxu0 %v292_v1  ;;  %v279_v5 = vld [vmem:[%s1555_s12 + $0x18] sm:$0xff]  ;;  %v281_v7 = vld [vmem:[%s1555_s12 + $0x28] sm:$0xff] }
  0x54   : > { %973 = vmatprep.mubr.msk.f32.mxu0 %vm293_vm0, %v276_v2  ;;  %972 = vmatpush3.msra.mxu0 %v292_v1  ;;  %v280_v6 = vld [vmem:[%s1555_s12 + $0x20] sm:$0xff]  ;;  %v282_v8 = vld [vmem:[%s1555_s12 + $0x30] sm:$0xff]  ;;  %v283_v9 = vld [vmem:[%s1555_s12 + $0x38] sm:$0xff] }
  0x55   : > { %974 = vmatmul.mubr.msk.f32.vlgmr.msra.gmra.mrb[0].mxu0 %vm293_vm0, %v277_v3  ;;  %v284_v10 = vld [vmem:[%s1555_s12 + $0x40] sm:$0xff]  ;;  %v285_v11 = vld [vmem:[%s1555_s12 + $0x48] sm:$0xff]  ;;  %v286_v12 = vld [vmem:[%s1555_s12 + $0x50] sm:$0xff] }
  0x56   : > { %976 = vmatprep.mubr.msk.f32.mxu0 %vm293_vm0, %v278_v4  ;;  %v287_v13 = vld [vmem:[%s1555_s12 + $0x58] sm:$0xff]  ;;  %v288_v14 = vld [vmem:[%s1555_s12 + $0x60] sm:$0xff]  ;;  %v289_v15 = vld [vmem:[%s1555_s12 + $0x68] sm:$0xff] }
  0x57   : > { %v290_v16 = vld [vmem:[%s1555_s12 + $0x70] sm:$0xff]  ;;  %v291_v17 = vld [vmem:[%s1555_s12 + $0x78] sm:$0xff]  ;;  %v503_v19 = vld [vmem:[%s1542_s28] sm:$0xff] }
  0x58   : > { %v509_v18 = vld [vmem:[%s1542_s28 + $0x30] sm:$0xff]  ;;  %v510_v44 = vld [vmem:[%s1542_s28 + $0x38] sm:$0xff]  ;;  %v504_v45 = vld [vmem:[%s1542_s28 + $0x8] sm:$0xff] }
  0x59   : > { %977 = vmatmul.mubr.msk.f32.gmra.mrb[2].mxu0 %vm293_vm0, %v279_v5  ;;  %1038 = vmatprep.mubr.f32.mxu1 %v509_v18  ;;  %v511_v46 = vld [vmem:[%s1542_s28 + $0x40] sm:$0xff]  ;;  %v505_v47 = vld [vmem:[%s1542_s28 + $0x10] sm:$0xff]  ;;  %v512_v48 = vld [vmem:[%s1542_s28 + $0x48] sm:$0xff] }
  0x5a   : > { %979 = vmatprep.mubr.msk.f32.mxu0 %vm293_vm0, %v280_v6  ;;  %v506_v49 = vld [vmem:[%s1542_s28 + $0x18] sm:$0xff]  ;;  %v513_v50 = vld [vmem:[%s1542_s28 + $0x50] sm:$0xff]  ;;  %v507_v51 = vld [vmem:[%s1542_s28 + $0x20] sm:$0xff] }
  0x5b   : > { %v514_v52 = vld [vmem:[%s1542_s28 + $0x58] sm:$0xff]  ;;  %v508_v53 = vld [vmem:[%s1542_s28 + $0x28] sm:$0xff]  ;;  %v515_v54 = vld [vmem:[%s1542_s28 + $0x60] sm:$0xff] }
  0x5c   : > { %v516_v55 = vld [vmem:[%s1542_s28 + $0x68] sm:$0xff]  ;;  %v517_v56 = vld [vmem:[%s1542_s28 + $0x70] sm:$0xff]  ;;  %v518_v57 = vld [vmem:[%s1542_s28 + $0x78] sm:$0xff] }
  0x5d   : > { %980 = vmatmul.mubr.msk.f32.gmra.mrb[4].mxu0 %vm293_vm0, %v281_v7  ;;  %v494_v58 = vld [vmem:[#allocation2 + $0x38] sm:$0xff]  ;;  %v488_v59 = vld [vmem:[#allocation2 + $0x8] sm:$0xff]  ;;  %v493_v60 = vld [vmem:[#allocation2 + $0x30] sm:$0xff] }
  0x5e   : > { %982 = vmatprep.mubr.msk.f32.mxu0 %vm293_vm0, %v282_v8  ;;  %v487_v61 = vld [vmem:[#allocation2] sm:$0xff]  ;;  %v496_v5 = vld [vmem:[#allocation2 + $0x48] sm:$0xff]  ;;  %v490_v7 = vld [vmem:[#allocation2 + $0x18] sm:$0xff] }
  0x5f   : > { %v495_v8 = vld [vmem:[#allocation2 + $0x40] sm:$0xff] }
  0x61   : > { %983 = vmatmul.mubr.msk.f32.gmra.mrb[6].mxu0 %vm293_vm0, %v283_v9  ;;  %v489_v9 = vld [vmem:[#allocation2 + $0x10] sm:$0xff] }
  0x62   : > { %985 = vmatprep.mubr.msk.f32.mxu0 %vm293_vm0, %v284_v10 }
  0x65   : > { %986 = vmatmul.mubr.msk.f32.gmra.mrb[8].mxu0 %vm293_vm0, %v285_v11 }
  0x66   : > { %988 = vmatprep.mubr.msk.f32.mxu0 %vm293_vm0, %v286_v12 }
  0x69   : > { %989 = vmatmul.mubr.msk.f32.gmra.mrb[10].mxu0 %vm293_vm0, %v287_v13 }
  0x6a   : > { %991 = vmatprep.mubr.msk.f32.mxu0 %vm293_vm0, %v288_v14 }
  0x6d   : > { %992 = vmatmul.mubr.msk.f32.gmra.mrb[12].mxu0 %vm293_vm0, %v289_v15 }
  0x6e   : > { %994 = vmatprep.mubr.msk.f32.mxu0 %vm293_vm0, %v290_v16 }
  0x71   : > { %995 = vmatmul.mubr.msk.f32.gmra.mrb[14].mxu0 %vm293_vm0, %v291_v17  ;;  %v498_v17 = vld [vmem:[#allocation2 + $0x58] sm:$0xff] }
  0x72   : > { %1029 = vmatprep.mubr.f32.mxu0 %v503_v19  ;;  %v492_v19 = vld [vmem:[#allocation2 + $0x28] sm:$0xff] }
 0x128   : > { %v975_v20 = vpop.f32.mrb[0].mxu0 }
 0x129   : > { %v408_v21 = vpop.f32.mrb[1].mxu0 }
 0x12a   : > { %v1053_v22 = vpack.c.bf16 %v975_v20, %v408_v21  ;;  %v497_v20 = vld [vmem:[#allocation2 + $0x50] sm:$0xff]  ;;  %v491_v21 = vld [vmem:[#allocation2 + $0x20] sm:$0xff] }
 0x12c   : > { %v978_v23 = vpop.f32.mrb[2].mxu0  ;;  %1054 = vmatprep.subr.bf16.mxu0 %v1053_v22  ;;  %1085 = vmatprep.subr.bf16.mxu1 %v1053_v22 }
 0x12d   : > { %v418_v24 = vpop.f32.mrb[3].mxu0  ;;  %1056 = vmatpush3.bf16.msra.mxu0 %v1053_v22  ;;  %1093 = vmatpush3.bf16.msra.mxu1 %v1053_v22 }
 0x12e   : > { %v1057_v25 = vpack.c.bf16 %v978_v23, %v418_v24 }
 0x130   : > { %v981_v26 = vpop.f32.mrb[4].mxu0  ;;  %1058 = vmatprep.subr.bf16.mxu0 %v1057_v25  ;;  %1086 = vmatprep.subr.bf16.mxu1 %v1057_v25 }
 0x131   : > { %v428_v27 = vpop.f32.mrb[5].mxu0  ;;  %1060 = vmatpush3.bf16.msra.mxu0 %v1057_v25  ;;  %1094 = vmatpush3.bf16.msra.mxu1 %v1057_v25 }
 0x132   : > { %v1061_v28 = vpack.c.bf16 %v981_v26, %v428_v27 }
 0x134   : > { %v984_v29 = vpop.f32.mrb[6].mxu0  ;;  %1062 = vmatprep.subr.bf16.mxu0 %v1061_v28  ;;  %1087 = vmatprep.subr.bf16.mxu1 %v1061_v28 }
 0x135   : > { %v438_v30 = vpop.f32.mrb[7].mxu0  ;;  %1064 = vmatpush3.bf16.msra.mxu0 %v1061_v28  ;;  %1095 = vmatpush3.bf16.msra.mxu1 %v1061_v28 }
 0x136   : > { %v1065_v31 = vpack.c.bf16 %v984_v29, %v438_v30  ;;  %v500_v29 = vld [vmem:[#allocation2 + $0x68] sm:$0xff] }
 0x138   : > { %v987_v32 = vpop.f32.mrb[8].mxu0  ;;  %1066 = vmatprep.subr.bf16.mxu0 %v1065_v31  ;;  %1088 = vmatprep.subr.bf16.mxu1 %v1065_v31 }
 0x139   : > { %v448_v33 = vpop.f32.mrb[9].mxu0  ;;  %1068 = vmatpush3.bf16.msra.mxu0 %v1065_v31  ;;  %1096 = vmatpush3.bf16.msra.mxu1 %v1065_v31  ;;  %v499_v31 = vld [vmem:[#allocation2 + $0x60] sm:$0xff] }
 0x13a   : > { %v1069_v34 = vpack.c.bf16 %v987_v32, %v448_v33 }
 0x13c   : > { %v990_v35 = vpop.f32.mrb[10].mxu0  ;;  %1070 = vmatprep.subr.bf16.mxu0 %v1069_v34  ;;  %1089 = vmatprep.subr.bf16.mxu1 %v1069_v34 }
 0x13d   : > { %v458_v36 = vpop.f32.mrb[11].mxu0  ;;  %1072 = vmatpush3.bf16.msra.mxu0 %v1069_v34  ;;  %1097 = vmatpush3.bf16.msra.mxu1 %v1069_v34 }
 0x13e   : > { %v1073_v37 = vpack.c.bf16 %v990_v35, %v458_v36  ;;  %v502_v36 = vld [vmem:[#allocation2 + $0x78] sm:$0xff] }
 0x140   : > { %v993_v38 = vpop.f32.mrb[12].mxu0  ;;  %1074 = vmatprep.subr.bf16.mxu0 %v1073_v37  ;;  %1090 = vmatprep.subr.bf16.mxu1 %v1073_v37 }
 0x141   : > { %v468_v39 = vpop.f32.mrb[13].mxu0  ;;  %1076 = vmatpush3.bf16.msra.mxu0 %v1073_v37  ;;  %1098 = vmatpush3.bf16.msra.mxu1 %v1073_v37  ;;  %v501_v37 = vld [vmem:[#allocation2 + $0x70] sm:$0xff] }
 0x142   : > { %v1077_v40 = vpack.c.bf16 %v993_v38, %v468_v39 }
 0x144   : > { %v996_v41 = vpop.f32.mrb[14].mxu0  ;;  %1078 = vmatprep.subr.bf16.mxu0 %v1077_v40  ;;  %1091 = vmatprep.subr.bf16.mxu1 %v1077_v40 }
 0x145   : > { %v478_v42 = vpop.f32.mrb[15].mxu0  ;;  %1080 = vmatpush3.bf16.msra.mxu0 %v1077_v40  ;;  %1099 = vmatpush3.bf16.msra.mxu1 %v1077_v40 }
 0x146   : > { %v1081_v43 = vpack.c.bf16 %v996_v41, %v478_v42 }
 0x148   : > { %1082 = vmatprep.subr.bf16.mxu0 %v1081_v43  ;;  %1092 = vmatprep.subr.bf16.mxu1 %v1081_v43 }
 0x149   : > { %1084 = vmatpush3.bf16.msra.mxu0 %v1081_v43  ;;  %1100 = vmatpush3.bf16.msra.mxu1 %v1081_v43  ;;  %v914_v43 = vld [vmem:[%s1706_s3] ss:$0 sm:$0xff] (!%p913_p7) }
 0x14c   : > { %1039 = vmatmul.mubr.f32.vlgmr.msra.gmra.mrb[0].mxu1 %v510_v44  ;;  %1030 = vmatmul.mubr.f32.vlgmr.msra.gmra.mrb[16].mxu0 %v504_v45 }
 0x14d   : > { %1041 = vmatprep.mubr.f32.mxu1 %v511_v46  ;;  %1032 = vmatprep.mubr.f32.mxu0 %v505_v47 }
 0x150   : > { %1042 = vmatmul.mubr.f32.gmra.mrb[2].mxu1 %v512_v48  ;;  %1033 = vmatmul.mubr.f32.gmra.mrb[18].mxu0 %v506_v49 }
 0x151   : > { %1044 = vmatprep.mubr.f32.mxu1 %v513_v50  ;;  %1035 = vmatprep.mubr.f32.mxu0 %v507_v51 }
 0x154   : > { %1045 = vmatmul.mubr.f32.gmra.mrb[4].mxu1 %v514_v52  ;;  %1036 = vmatmul.mubr.f32.gmra.mrb[20].mxu0 %v508_v53 }
 0x155   : > { %1047 = vmatprep.mubr.f32.mxu1 %v515_v54 }
 0x158   : > { %1048 = vmatmul.mubr.f32.gmra.mrb[6].mxu1 %v516_v55 }
 0x159   : > { %1050 = vmatprep.mubr.f32.mxu1 %v517_v56 }
 0x15c   : > { %1051 = vmatmul.mubr.f32.gmra.mrb[8].mxu1 %v518_v57 }
 0x21f   : > { %v1040_v62 = vpop.f32.mrb[0].mxu1  ;;  %v1031_v63 = vpop.f32.mrb[16].mxu0 }
 0x220   : > { %v671_v0 = vadd.f32 %v1040_v62, %v494_v58  ;;  %v615_v1 = vpop.f32.mrb[1].mxu1  ;;  %v665_v2 = vadd.f32 %v1031_v63, %v488_v59  ;;  %v585_v3 = vpop.f32.mrb[17].mxu0 }
 0x221   : > { %v670_v4 = vadd.f32 %v615_v1, %v493_v60  ;;  %v664_v6 = vadd.f32 %v585_v3, %v487_v61 }
 0x222   : > { %687 = vst [vmem:[#allocation2 + $0x38] sm:$0xff] %v671_v0  ;;  %681 = vst [vmem:[#allocation2 + $0x8] sm:$0xff] %v665_v2 }
 0x223   : > { %686 = vst [vmem:[#allocation2 + $0x30] sm:$0xff] %v670_v4  ;;  %v1043_v10 = vpop.f32.mrb[2].mxu1  ;;  %680 = vst [vmem:[#allocation2] sm:$0xff] %v664_v6  ;;  %v1034_v11 = vpop.f32.mrb[18].mxu0 }
 0x224   : > { %v673_v12 = vadd.f32 %v1043_v10, %v496_v5  ;;  %v625_v13 = vpop.f32.mrb[3].mxu1  ;;  %v667_v14 = vadd.f32 %v1034_v11, %v490_v7  ;;  %v595_v15 = vpop.f32.mrb[19].mxu0 }
 0x225   : > { %v672_v16 = vadd.f32 %v625_v13, %v495_v8  ;;  %v666_v18 = vadd.f32 %v595_v15, %v489_v9 }
 0x226   : > { %689 = vst [vmem:[#allocation2 + $0x48] sm:$0xff] %v673_v12  ;;  %683 = vst [vmem:[#allocation2 + $0x18] sm:$0xff] %v667_v14 }
 0x227   : > { %688 = vst [vmem:[#allocation2 + $0x40] sm:$0xff] %v672_v16  ;;  %v1046_v22 = vpop.f32.mrb[4].mxu1  ;;  %682 = vst [vmem:[#allocation2 + $0x10] sm:$0xff] %v666_v18  ;;  %v1037_v23 = vpop.f32.mrb[20].mxu0 }
 0x228   : > { %v675_v24 = vadd.f32 %v1046_v22, %v498_v17  ;;  %v635_v25 = vpop.f32.mrb[5].mxu1  ;;  %v669_v26 = vadd.f32 %v1037_v23, %v492_v19  ;;  %v605_v27 = vpop.f32.mrb[21].mxu0 }
 0x229   : > { %v674_v28 = vadd.f32 %v635_v25, %v497_v20  ;;  %v668_v30 = vadd.f32 %v605_v27, %v491_v21  ;;  %v701_v44 = vld [vmem:[#allocation2 + $0x8] sm:$0xff] (!%p913_p7)  ;;  %v707_v55 = vld [vmem:[#allocation2 + $0x38] sm:$0xff] (!%p913_p7) }
 0x22a   : > { %691 = vst [vmem:[#allocation2 + $0x58] sm:$0xff] %v675_v24  ;;  %685 = vst [vmem:[#allocation2 + $0x28] sm:$0xff] %v669_v26  ;;  %v700_v42 = vld [vmem:[#allocation2] sm:$0xff] (!%p913_p7)  ;;  %v724_v46 = vadd.f32 (!%p913_p7), %v914_v43, %v701_v44  ;;  %v706_v54 = vld [vmem:[#allocation2 + $0x30] sm:$0xff] (!%p913_p7)  ;;  %v730_v2 = vadd.f32 (!%p913_p7), %v914_v43, %v707_v55 }
 0x22b   : > { %690 = vst [vmem:[#allocation2 + $0x50] sm:$0xff] %v674_v28  ;;  %v1049_v32 = vpop.f32.mrb[6].mxu1  ;;  %684 = vst [vmem:[#allocation2 + $0x20] sm:$0xff] %v668_v30  ;;  %v723_v45 = vadd.f32 (!%p913_p7), %v914_v43, %v700_v42  ;;  %v729_v59 = vadd.f32 (!%p913_p7), %v914_v43, %v706_v54 }
 0x22c   : > { %v677_v33 = vadd.f32 %v1049_v32, %v500_v29  ;;  %v645_v34 = vpop.f32.mrb[7].mxu1  ;;  %v740_v57 = vmax.f32 (!%p913_p7), %v724_v46, 0.0  ;;  %v746_v12 = vmax.f32 (!%p913_p7), %v730_v2, 0.0 }
 0x22d   : > { %v676_v35 = vadd.f32 %v645_v34, %v499_v31  ;;  %699 = sbr.rel (%p913_p7) target bundleno = 576 (0x240), region = 48  ;;  %v703_v48 = vld [vmem:[#allocation2 + $0x18] sm:$0xff] (!%p913_p7)  ;;  %v739_v56 = vmax.f32 (!%p913_p7), %v723_v45, 0.0  ;;  %v709_v61 = vld [vmem:[#allocation2 + $0x48] sm:$0xff] (!%p913_p7)  ;;  %v745_v7 = vmax.f32 (!%p913_p7), %v729_v59, 0.0 }
 0x22e   : > { %693 = vst [vmem:[#allocation2 + $0x68] sm:$0xff] %v677_v33  ;;  %v702_v47 = vld [vmem:[#allocation2 + $0x10] sm:$0xff] (!%p913_p7)  ;;  %v726_v51 = vadd.f32 (!%p913_p7), %v914_v43, %v703_v48  ;;  %v708_v60 = vld [vmem:[#allocation2 + $0x40] sm:$0xff] (!%p913_p7)  ;;  %756 = vst [vmem:[%s1557_s9 + $0x8] sm:$0xff] (!%p913_p7), %v740_v57  ;;  %v732_v9 = vadd.f32 (!%p913_p7), %v914_v43, %v709_v61 }
 0x22f   : > { %692 = vst [vmem:[#allocation2 + $0x60] sm:$0xff] %v676_v35  ;;  %v1052_v38 = vpop.f32.mrb[8].mxu1  ;;  %v725_v50 = vadd.f32 (!%p913_p7), %v914_v43, %v702_v47  ;;  %755 = vst [vmem:[%s1557_s9] sm:$0xff] (!%p913_p7), %v739_v56  ;;  %v731_v8 = vadd.f32 (!%p913_p7), %v914_v43, %v708_v60 }
 0x230   : > { %v679_v39 = vadd.f32 %v1052_v38, %v502_v36  ;;  %v655_v40 = vpop.f32.mrb[9].mxu1  ;;  %v742_v0 = vmax.f32 (!%p913_p7), %v726_v51, 0.0  ;;  %761 = vst [vmem:[%s1557_s9 + $0x30] sm:$0xff] (!%p913_p7), %v745_v7  ;;  %v748_v17 = vmax.f32 (!%p913_p7), %v732_v9, 0.0  ;;  %762 = vst [vmem:[%s1557_s9 + $0x38] sm:$0xff] (!%p913_p7), %v746_v12 }
 0x231   : > { %v678_v41 = vadd.f32 %v655_v40, %v501_v37  ;;  %v705_v53 = vld [vmem:[#allocation2 + $0x28] sm:$0xff] (!%p913_p7)  ;;  %v741_v63 = vmax.f32 (!%p913_p7), %v725_v50, 0.0  ;;  %v711_v3 = vld [vmem:[#allocation2 + $0x58] sm:$0xff] (!%p913_p7)  ;;  %v747_v16 = vmax.f32 (!%p913_p7), %v731_v8, 0.0 }
 0x232   : > { %695 = vst [vmem:[#allocation2 + $0x78] sm:$0xff] %v679_v39  ;;  %v704_v49 = vld [vmem:[#allocation2 + $0x20] sm:$0xff] (!%p913_p7)  ;;  %v728_v58 = vadd.f32 (!%p913_p7), %v914_v43, %v705_v53  ;;  %v710_v62 = vld [vmem:[#allocation2 + $0x50] sm:$0xff] (!%p913_p7)  ;;  %758 = vst [vmem:[%s1557_s9 + $0x18] sm:$0xff] (!%p913_p7), %v742_v0  ;;  %v734_v14 = vadd.f32 (!%p913_p7), %v914_v43, %v711_v3 }
 0x233   : > { %694 = vst [vmem:[#allocation2 + $0x70] sm:$0xff] %v678_v41  ;;  %v727_v52 = vadd.f32 (!%p913_p7), %v914_v43, %v704_v49  ;;  %757 = vst [vmem:[%s1557_s9 + $0x10] sm:$0xff] (!%p913_p7), %v741_v63  ;;  %v733_v13 = vadd.f32 (!%p913_p7), %v914_v43, %v710_v62 }
 0x234   : > { %v744_v6 = vmax.f32 %v728_v58, 0.0  ;;  %v750_v21 = vmax.f32 %v734_v14, 0.0  ;;  %763 = vst [vmem:[%s1557_s9 + $0x40] sm:$0xff] %v747_v16  ;;  %764 = vst [vmem:[%s1557_s9 + $0x48] sm:$0xff] %v748_v17 }
 0x235   : > { %v743_v1 = vmax.f32 %v727_v52, 0.0  ;;  %v713_v5 = vld [vmem:[#allocation2 + $0x68] sm:$0xff]  ;;  %v749_v20 = vmax.f32 %v733_v13, 0.0 }
 0x236   : > { %v712_v4 = vld [vmem:[#allocation2 + $0x60] sm:$0xff]  ;;  %760 = vst [vmem:[%s1557_s9 + $0x28] sm:$0xff] %v744_v6  ;;  %v736_v18 = vadd.f32 %v914_v43, %v713_v5  ;;  %766 = vst [vmem:[%s1557_s9 + $0x58] sm:$0xff] %v750_v21 }
 0x237   : > { %759 = vst [vmem:[%s1557_s9 + $0x20] sm:$0xff] %v743_v1  ;;  %v735_v15 = vadd.f32 %v914_v43, %v712_v4  ;;  %765 = vst [vmem:[%s1557_s9 + $0x50] sm:$0xff] %v749_v20 }
 0x238   : > { %v752_v24 = vmax.f32 %v736_v18, 0.0 }
 0x239   : > { %v715_v11 = vld [vmem:[#allocation2 + $0x78] sm:$0xff]  ;;  %v751_v22 = vmax.f32 %v735_v15, 0.0 }
 0x23a   : > { %v714_v10 = vld [vmem:[#allocation2 + $0x70] sm:$0xff]  ;;  %v738_v23 = vadd.f32 %v914_v43, %v715_v11  ;;  %768 = vst [vmem:[%s1557_s9 + $0x68] sm:$0xff] %v752_v24 }
 0x23b   : > { %v737_v19 = vadd.f32 %v914_v43, %v714_v10  ;;  %767 = vst [vmem:[%s1557_s9 + $0x60] sm:$0xff] %v751_v22 }
 0x23c   : > { %v754_v26 = vmax.f32 %v738_v23, 0.0 }
 0x23d   : > { %v753_v25 = vmax.f32 %v737_v19, 0.0 }
 0x23e   : > { %770 = vst [vmem:[%s1557_s9 + $0x78] sm:$0xff] %v754_v26 }
 0x23f   : > { %769 = vst [vmem:[%s1557_s9 + $0x70] sm:$0xff] %v753_v25 }
 0x240 PF: > { %s921_s21 = sshll.u32 %s1349_s22, 11  ;;  %s785_s26 = sshll.u32 %s1557_s9, 4  ;;  %s1638_s26 = int_to_ptr.vmem [resolvable:$true] %s785_s26 }
 0x241   : > { %s1635_s27 = scalar_lea.hbm %s1707_s4, %s921_s21  ;;  %s1642_s6 = scalar_lea.sflag [#allocation5], %s245_s29 }
 0x242   : > { %s1239_s5 = scalar_lea.vmem %s1638_s26, 2048  ;;  %p1719_p0 = scmp.ne.s32.totalorder %s1715_s11, 0 }
 0x243   : > { %p1240_p4 = scmp.ne.s32.totalorder %s1638_s26, %s1239_s5  ;;  %s1368_s22 = smov [#allocation6]  }
 0x244   : > { %s1243_s12 = sshll.u32 %s1368_s22, 4  ;;  %s1244_s12 = int_to_ptr.vmem [resolvable:$false] %s1243_s12 }
 0x245   : > { %p1241_p1 = pnand %p1240_p4, %p1719_p0  ;;  %s1245_s8 = scalar_lea.vmem %s1244_s12, 4096 }
 0x246   : > { %p1246_p8 = scmp.lt.s32.totalorder %s1638_s26, %s1244_s12  ;;  %p1247_p3 = scmp.lt.s32.totalorder %s1245_s8, %s1239_s5 }
 0x247   : > { %p1242_p5 = pneg %p1241_p1 }
 0x248   : > { %p1248_p10 = por %p1247_p3, %p1246_p8 }
 0x24a   : > { %p1249_p11 = pnand %p1248_p10, %p1242_p5 }
 0x24c   : > { %1252 = shalt.err (!%p1249_p11)
}
 0x24d   : > { %s1253_s29 = scalar_lea.hbm %s1635_s27, 2048  ;;  %s1257_s18 = scalar_lea.hbm %s1707_s4, 4096 }
 0x24e   : > { %p1254_p6 = scmp.ne.s32.totalorder %s1635_s27, %s1253_s29  ;;  %p1258_p12 = scmp.lt.u32.totalorder %s1635_s27, %s1707_s4 }
 0x24f   : > { %p1259_p2 = scmp.lt.u32.totalorder %s1257_s18, %s1253_s29  ;;  %p1261_p4 = scmp.lt.u32.totalorder %s1253_s29, %s1635_s27 }
 0x250   : > { %p1255_p9 = pnand %p1254_p6, %p1719_p0 }
 0x251   : > { %p1260_p7 = por %p1259_p2, %p1258_p12 }
 0x252   : > { %p1256_p13 = pneg %p1255_p9 }
 0x253   : > { %p1262_p1 = por %p1261_p4, %p1260_p7 }
 0x255   : > { %p1263_p5 = pnand %p1262_p1, %p1256_p13 }
 0x257   : > { %1266 = shalt.err (!%p1263_p5)
}
 0x258   : > { %s1369_s28 = smov 128   ;;  %s1370_s30 = smov 8  }
 0x259   : > { %1103 = dma.vmem_to_hbm [thread:$0]  (%p1719_p0), %s1638_s26, 2048, %s1635_s27, %s1642_s6, %s1369_s28, %s1369_s28, %s1370_s30  }
 0x25a PF: > { %p1114_p8 = scmp.ge.s32.totalorder %s1361_s25, 2  ;;  %s800_s5 = sand.u32 1, %s1321_s15  }
 0x25b   : > { %p1720_p3 = scmp.ne.s32.totalorder %s1717_s14, 0  ;;  %s801_s22 = scalar_lea.sflag [#allocation5], %s800_s5 }
 0x25d   : > { %p1110_p10 = pnand %p1114_p8, %p1720_p3 }
 0x25f   : > { %1316 = dma.done.wait (!%p1110_p10), %s801_s22, 2048  }
 0x260   : > { %1318 = vsyncadd (!%p1110_p10), %s801_s22, 4294965248  ;;  %s20_s25 = sadd.s32 1, %s1361_s25   ;;  %s1721_s12 = sld [smem:[#allocation11_spill]] }
 0x261   : > { %p17_p11 = scmp.ge.s32.totalorder %s20_s25, 6   ;;  %s1722_s11 = sld [smem:[#allocation9_spill]] }
 0x262   : > { %s1723_s27 = sld [smem:[#allocation10_spill]]  ;;  %s1724_s15 = smov %s1325_s16 }
 0x263   : > { %s1725_s16 = smov %s1329_s17  ;;  %s1727_s18 = smov %s1337_s19 }
 0x264   : > { %s1728_s19 = smov %s1341_s20  ;;  %s1729_s20 = smov %s1486_s13 }
 0x265   : > { %s1730_s21 = smov %s1353_s23  ;;  %s1731_s22 = smov %s1357_s24 }
 0x266   : > { %s1726_s17 = smov %s1721_s12  ;;  %19 = sbr.rel (!%p17_p11) target bundleno = 9 (0x9), region = 92 }
 0x267   : > { %s1732_s23 = smov %s1722_s11 }
 0x268   : > { %s1733_s24 = smov %s1723_s27 }
 0x26d   :  { %806 = vsyncpa [#allocation4], 1 }
 0x26e   :  { %808 = vsyncpa [#allocation4 + $0x1], 1 }
 0x26f   :  { %809 = vsyncpa [#allocation5], 1 }
 0x270   :  { %811 = vsyncpa [#allocation5 + $0x1], 1 }

</bundles_post_ra>
